<compile_context>
chip_gen: v7x
topology: tpu7x:2x2x1
jax: 0.10.0
libtpu: 0.0.40
codegen_flags: <defaults>
</compile_context>

<pallas_src>
import functools

import jax
import jax.numpy as jnp
from jax.experimental import pallas as pl
from jax.experimental.pallas import tpu as pltpu


# --------------------------------------------------------------------------- #
# Fused single-block kernel: whole (C, Lp) tile resident in VMEM, one x read. #
# --------------------------------------------------------------------------- #
def _asp_fused_kernel(nvalid_ref, x_ref,
                      w1x_ref, w1ms_ref, b1_ref, bn_s_ref, bn_b_ref,
                      w2_ref, b2_ref, out_ref, *, eps):
    b = pl.program_id(0)
    x = x_ref[0]                                       # (C, Lp) bf16
    lp = x.shape[1]

    nv = nvalid_ref[b]                                 # valid frames (int32, SMEM)
    mask_row = jax.lax.broadcasted_iota(jnp.int32, (1, lp), 1) < nv
    mask_col = (jax.lax.broadcasted_iota(jnp.int32, (lp, 1), 0) < nv
                ).astype(jnp.bfloat16)                 # (Lp, 1)

    # ---- global-context stats: masked sums as MXU matvecs, f32 accumulation
    n = jnp.maximum(nv.astype(jnp.float32), 1.0)       # guard lengths == 0
    inv_n = 1.0 / n
    sum_x = jnp.dot(x, mask_col, preferred_element_type=jnp.float32)       # (C,1)
    sum_x2 = jnp.dot(x * x, mask_col, preferred_element_type=jnp.float32)  # (C,1)
    mean_g = sum_x * inv_n
    var_g = sum_x2 * inv_n - mean_g * mean_g
    std_g = jnp.sqrt(jnp.maximum(var_g, eps))

    # ---- TDNN block (k=1 conv -> ReLU -> folded BN -> tanh), bf16 MXU
    ms = jnp.concatenate([mean_g, std_g], axis=0).astype(jnp.bfloat16)     # (2C,1)
    hb = jnp.dot(w1ms_ref[...], ms,
                 preferred_element_type=jnp.float32) + b1_ref[...]         # (A,1)
    h = jnp.dot(w1x_ref[...], x, preferred_element_type=jnp.float32) + hb  # (A,Lp)
    h = jnp.maximum(h, 0.0)
    h = jnp.tanh(h * bn_s_ref[...] + bn_b_ref[...])

    # ---- attention logits + masked softmax (alpha never materialized)
    e = jnp.dot(w2_ref[...], h.astype(jnp.bfloat16),
                preferred_element_type=jnp.float32) + b2_ref[...]          # (C,Lp)
    e = jnp.where(mask_row, e, -jnp.inf)
    p = jnp.exp(e - jnp.max(e, axis=1, keepdims=True))  # masked frames -> 0

    # ---- attentive statistics: f32 math, reductions as MXU matvecs
    ones_col = jnp.ones((lp, 1), jnp.float32)
    x32 = x.astype(jnp.float32)
    px = p * x32
    pxsq = px * x32
    s = jnp.dot(p, ones_col, preferred_element_type=jnp.float32)           # (C,1)
    spx = jnp.dot(px, ones_col, preferred_element_type=jnp.float32)
    spx2 = jnp.dot(pxsq, ones_col, preferred_element_type=jnp.float32)
    inv_s = pl.reciprocal(s, approx=True)               # EUP
    mean_a = spx * inv_s
    var_a = spx2 * inv_s - mean_a * mean_a
    std_a = jnp.sqrt(jnp.maximum(var_a, eps))

    # lane-dense (1, 2C) store; wrapper reshapes to (2C, 1)
    out_ref[0] = jnp.concatenate([mean_a, std_a], axis=0).T


# --------------------------------------------------------------------------- #
# L-chunked streaming kernel (two passes over x, online softmax in pass 1).   #
# Grid: (B, pass, L-chunk); peak VMEM is O(C * TL).                           #
# --------------------------------------------------------------------------- #
def _asp_chunked_kernel(nvalid_ref, x_ref,
                        w1x_ref, w1ms_ref, b1_ref, bn_s_ref, bn_b_ref,
                        w2_ref, b2_ref, out_ref,
                        sumx_ref, sumx2_ref, hb_ref,
                        m_ref, s_ref, spx_ref, spx2_ref, *, eps):
    b = pl.program_id(0)
    ps = pl.program_id(1)            # 0: global-stats pass, 1: attention pass
    lc = pl.program_id(2)            # L-chunk index
    nl = pl.num_programs(2)

    x = x_ref[0]                     # (C, TL) bf16
    tl = x.shape[1]
    nv = nvalid_ref[b]
    base = lc * tl
    mask_col = ((jax.lax.broadcasted_iota(jnp.int32, (tl, 1), 0) + base) < nv
                ).astype(jnp.bfloat16)

    # -------------------- pass 0: masked global sums --------------------
    @pl.when(ps == 0)
    def _():
        @pl.when(lc == 0)
        def _():
            sumx_ref[...] = jnp.zeros(sumx_ref.shape, jnp.float32)
            sumx2_ref[...] = jnp.zeros(sumx2_ref.shape, jnp.float32)

        sumx_ref[...] += jnp.dot(x, mask_col, preferred_element_type=jnp.float32)
        sumx2_ref[...] += jnp.dot(x * x, mask_col,
                                  preferred_element_type=jnp.float32)

        @pl.when(lc == nl - 1)
        def _():
            n = jnp.maximum(nv.astype(jnp.float32), 1.0)   # guard lengths == 0
            inv_n = 1.0 / n
            mean_g = sumx_ref[...] * inv_n
            var_g = sumx2_ref[...] * inv_n - mean_g * mean_g
            std_g = jnp.sqrt(jnp.maximum(var_g, eps))
            ms = jnp.concatenate([mean_g, std_g], axis=0).astype(jnp.bfloat16)
            # per-sample constant part of the TDNN pre-activation (hoisted
            # out of the per-chunk loop of pass 1)
            hb_ref[...] = (jnp.dot(w1ms_ref[...], ms,
                                   preferred_element_type=jnp.float32)
                           + b1_ref[...])

    # -------- pass 1: attention logits + online-softmax statistics --------
    @pl.when(ps == 1)
    def _():
        @pl.when(lc == 0)
        def _():
            m_ref[...] = jnp.full(m_ref.shape, -jnp.inf, jnp.float32)
            s_ref[...] = jnp.zeros(s_ref.shape, jnp.float32)
            spx_ref[...] = jnp.zeros(spx_ref.shape, jnp.float32)
            spx2_ref[...] = jnp.zeros(spx2_ref.shape, jnp.float32)

        h = (jnp.dot(w1x_ref[...], x, preferred_element_type=jnp.float32)
             + hb_ref[...])
        h = jnp.maximum(h, 0.0)
        h = jnp.tanh(h * bn_s_ref[...] + bn_b_ref[...])
        e = (jnp.dot(w2_ref[...], h.astype(jnp.bfloat16),
                     preferred_element_type=jnp.float32) + b2_ref[...])    # (C,TL)
        mask_row = (jax.lax.broadcasted_iota(jnp.int32, (1, tl), 1) + base) < nv
        e = jnp.where(mask_row, e, -jnp.inf)

        m_new = jnp.maximum(m_ref[...], jnp.max(e, axis=1, keepdims=True))
        alpha = jnp.exp(m_ref[...] - m_new)
        p = jnp.exp(e - m_new)                       # masked frames -> exactly 0
        x32 = x.astype(jnp.float32)
        px = p * x32
        pxsq = px * x32
        ones_col = jnp.ones((tl, 1), jnp.float32)
        s_ref[...] = alpha * s_ref[...] + jnp.dot(
            p, ones_col, preferred_element_type=jnp.float32)
        spx_ref[...] = alpha * spx_ref[...] + jnp.dot(
            px, ones_col, preferred_element_type=jnp.float32)
        spx2_ref[...] = alpha * spx2_ref[...] + jnp.dot(
            pxsq, ones_col, preferred_element_type=jnp.float32)
        m_ref[...] = m_new

        @pl.when(lc == nl - 1)
        def _():
            inv_s = pl.reciprocal(s_ref[...], approx=True)
            mean_a = spx_ref[...] * inv_s
            var_a = spx2_ref[...] * inv_s - mean_a * mean_a
            std_a = jnp.sqrt(jnp.maximum(var_a, eps))
            out_ref[0] = jnp.concatenate([mean_a, std_a], axis=0).T


# --------------------------------------------------------------------------- #
# Wrapper                                                                      #
# --------------------------------------------------------------------------- #
def _fold_params(params, C, bn_eps):
    A = params["tdnn_w"].shape[0]
    w1 = params["tdnn_w"].reshape(A, 3 * C)                  # kernel_size == 1
    w1x = w1[:, :C].astype(jnp.bfloat16)                     # acts on x
    w1ms = w1[:, C:].astype(jnp.bfloat16)                    # acts on [mean; std]
    b1 = params["tdnn_b"].reshape(A, 1).astype(jnp.float32)
    bn_scale = params["bn_gamma"] / jnp.sqrt(params["bn_rv"] + bn_eps)
    bn_shift = params["bn_beta"] - params["bn_rm"] * bn_scale
    bn_scale = bn_scale.reshape(A, 1).astype(jnp.float32)
    bn_shift = bn_shift.reshape(A, 1).astype(jnp.float32)
    w2 = params["conv_w"].reshape(C, A).astype(jnp.bfloat16)
    b2 = params["conv_b"].reshape(C, 1).astype(jnp.float32)
    return A, (w1x, w1ms, b1, bn_scale, bn_shift, w2, b2)


def _vmem_budget_bytes():
    phys = 64 * 1024 * 1024                   # conservative fallback (v7x per-TC)
    try:
        phys = int(pltpu.get_tpu_info().vmem_capacity_bytes)
    except Exception:
        pass
    # ~15% headroom for compiler-internal scratch / double buffers;
    # clamp into a sane range (>= 32 MiB, <= 110 MiB).
    return int(min(max(32 * 1024 * 1024, 0.85 * phys), 110 * 1024 * 1024))


def _weight_specs(A, C, zmap):
    return [pl.BlockSpec((A, C), zmap), pl.BlockSpec((A, 2 * C), zmap),
            pl.BlockSpec((A, 1), zmap), pl.BlockSpec((A, 1), zmap),
            pl.BlockSpec((A, 1), zmap), pl.BlockSpec((C, A), zmap),
            pl.BlockSpec((C, 1), zmap)]


def attentive_statistics_pooling(x, params, lengths=None, eps=1e-12, bn_eps=1e-5,
                                 force_chunked=None, chunk_target=512):
    """x: (B, C, L) float32. Returns (B, 2C, 1) float32."""
    B, C, L = x.shape
    if lengths is None:
        lengths = jnp.ones((B,), jnp.float32)

    # #valid frames per sample == |{i : i < lengths * L}| (matches length_to_mask)
    limit_f = lengths.astype(jnp.float32) * jnp.float32(L)
    n_valid = jnp.clip(jnp.ceil(limit_f), 0, L).astype(jnp.int32)       # (B,)

    # Pad time axis to a lane multiple of 128 and stream x as bf16 (halves the
    # dominant HBM stream; padded frames are masked out in-kernel).
    Lp = max(128, ((L + 127) // 128) * 128)
    x_bf = x.astype(jnp.bfloat16)
    if Lp != L:
        x_bf = jnp.pad(x_bf, ((0, 0), (0, 0), (0, Lp - L)))

    A, weights = _fold_params(params, C, bn_eps)

    budget = _vmem_budget_bytes()
    # Rough live-VMEM estimate of the fused single-block path.
    fused_need = (2 * C * Lp * 2            # double-buffered bf16 x block
                  + 6 * C * Lp * 4          # f32 temporaries (e, p, x32, px, ...)
                  + 2 * A * Lp * 4          # TDNN activations
                  + 4 * (1 << 20))          # weights + headroom
    use_chunked = (force_chunked if force_chunked is not None
                   else fused_need > budget)

    out_shape = jax.ShapeDtypeStruct((B, 1, 2 * C), jnp.float32)

    if not use_chunked:
        zmap = lambda b, nv: (0, 0)
        out = pl.pallas_call(
            functools.partial(_asp_fused_kernel, eps=eps),
            out_shape=out_shape,
            grid_spec=pltpu.PrefetchScalarGridSpec(
                num_scalar_prefetch=1,                     # n_valid -> SMEM
                grid=(B,),
                in_specs=[pl.BlockSpec((1, C, Lp), lambda b, nv: (b, 0, 0))]
                         + _weight_specs(A, C, zmap),
                out_specs=pl.BlockSpec((1, 1, 2 * C), lambda b, nv: (b, 0, 0)),
            ),
            compiler_params=pltpu.CompilerParams(
                dimension_semantics=("parallel",),
                vmem_limit_bytes=budget),
        )(n_valid, x_bf, *weights)
    else:
        # Largest multiple-of-128 chunk <= chunk_target that divides Lp.
        TL = 128
        for cand in (1024, 512, 256, 128):
            if cand <= max(chunk_target, 128) and Lp % cand == 0:
                TL = cand
                break
        NL = Lp // TL
        # TODO(synk): for B == 1 on v7x, make the chunk axis core-parallel
        # (per-core partial stats + cross-core combine) so both TCs stay busy.
        zmap = lambda b, ps, l, nv: (0, 0)
        out = pl.pallas_call(
            functools.partial(_asp_chunked_kernel, eps=eps),
            out_shape=out_shape,
            grid_spec=pltpu.PrefetchScalarGridSpec(
                num_scalar_prefetch=1,
                grid=(B, 2, NL),
                in_specs=[pl.BlockSpec((1, C, TL),
                                       lambda b, ps, l, nv: (b, 0, l))]
                         + _weight_specs(A, C, zmap),
                out_specs=pl.BlockSpec((1, 1, 2 * C),
                                       lambda b, ps, l, nv: (b, 0, 0)),
                scratch_shapes=[pltpu.VMEM((C, 1), jnp.float32),   # sum x
                                pltpu.VMEM((C, 1), jnp.float32),   # sum x^2
                                pltpu.VMEM((A, 1), jnp.float32),   # hb
                                pltpu.VMEM((C, 1), jnp.float32),   # running max
                                pltpu.VMEM((C, 1), jnp.float32),   # sum p
                                pltpu.VMEM((C, 1), jnp.float32),   # sum p*x
                                pltpu.VMEM((C, 1), jnp.float32)],  # sum p*x^2
            ),
            compiler_params=pltpu.CompilerParams(
                dimension_semantics=("parallel", "arbitrary", "arbitrary"),
                vmem_limit_bytes=budget),
        )(n_valid, x_bf, *weights)

    return out.reshape(B, 2 * C, 1)


# --------------------------------------------------------------------------- #
# Plain-JAX (f32) replica of the PyTorch forward, for verification.           #
# --------------------------------------------------------------------------- #
def _reference(x, params, lengths=None, eps=1e-12, bn_eps=1e-5):
    B, C, L = x.shape
    if lengths is None:
        lengths = jnp.ones((B,), jnp.float32)
    mask = (jnp.arange(L, dtype=jnp.float32)[None, :]
            < (lengths * L)[:, None]).astype(jnp.float32)[:, None, :]   # (B,1,L)
    w = mask / mask.sum(axis=2, keepdims=True)
    mean = (w * x).sum(2)
    std = jnp.sqrt(jnp.clip((w * (x - mean[:, :, None]) ** 2).sum(2), eps, None))
    attn = jnp.concatenate(
        [x, jnp.repeat(mean[:, :, None], L, 2), jnp.repeat(std[:, :, None], L, 2)],
        axis=1)
    w1 = params["tdnn_w"][:, :, 0]
    h = jnp.einsum("ac,bcl->bal", w1, attn) + params["tdnn_b"][None, :, None]
    h = jnp.maximum(h, 0.0)
    h = ((h - params["bn_rm"][None, :, None])
         / jnp.sqrt(params["bn_rv"][None, :, None] + bn_eps)
         * params["bn_gamma"][None, :, None] + params["bn_beta"][None, :, None])
    h = jnp.tanh(h)
    e = (jnp.einsum("ca,bal->bcl", params["conv_w"][:, :, 0], h)
         + params["conv_b"][None, :, None])
    e = jnp.where(mask == 0, -jnp.inf, e)
    alpha = jax.nn.softmax(e, axis=2)
    mean2 = (alpha * x).sum(2)
    std2 = jnp.sqrt(jnp.clip((alpha * (x - mean2[:, :, None]) ** 2).sum(2),
                             eps, None))
    return jnp.concatenate([mean2, std2], axis=1)[:, :, None]


if __name__ == "__main__":
    B, C, L = 2, 8, 16          # batch, channels, time frames
    A = 32                      # attention_channels

    key = jax.random.PRNGKey(0)
    (k_x, k_x2, k_w1, k_b1, k_g, k_bb,
     k_rm, k_rv, k_w2, k_b2) = jax.random.split(key, 10)

    x = jax.random.normal(k_x, (B, C, L), jnp.float32)
    params = {
        # TDNNBlock: Conv1d(3C -> A, k=1) + ReLU + BatchNorm1d(A)  (Dropout p=0)
        "tdnn_w": 0.1 * jax.random.normal(k_w1, (A, 3 * C, 1), jnp.float32),
        "tdnn_b": 0.1 * jax.random.normal(k_b1, (A,), jnp.float32),
        "bn_gamma": 1.0 + 0.05 * jax.random.normal(k_g, (A,), jnp.float32),
        "bn_beta": 0.05 * jax.random.normal(k_bb, (A,), jnp.float32),
        "bn_rm": 0.05 * jax.random.normal(k_rm, (A,), jnp.float32),
        "bn_rv": 1.0 + 0.1 * jnp.abs(jax.random.normal(k_rv, (A,), jnp.float32)),
        # final Conv1d(A -> C, k=1)
        "conv_w": 0.1 * jax.random.normal(k_w2, (C, A, 1), jnp.float32),
        "conv_b": 0.1 * jax.random.normal(k_b2, (C,), jnp.float32),
    }

    # bf16 x stream + bf16 MXU weights + approx reciprocal vs. all-f32 reference.
    TOL = 3e-2

    def _check(out, ref):
        assert out.shape == ref.shape, (out.shape, ref.shape)
        err = float(jnp.max(jnp.abs(out - ref)))
        assert jnp.allclose(out, ref, atol=TOL, rtol=TOL), err

    # 1) fused single-block path, full lengths
    out = jax.block_until_ready(attentive_statistics_pooling(x, params))
    _check(out, _reference(x, params))

    # 2) fused path, ragged lengths (exercises the in-kernel mask)
    lengths = jnp.array([1.0, 0.75], jnp.float32)
    out = jax.block_until_ready(
        attentive_statistics_pooling(x, params, lengths=lengths))
    _check(out, _reference(x, params, lengths=lengths))

    # 3) L-chunked two-pass / online-softmax path (forced), multi-chunk L,
    #    ragged lengths including a fully masked trailing chunk.
    L2 = 300
    x2 = jax.random.normal(k_x2, (B, C, L2), jnp.float32)
    lengths2 = jnp.array([1.0, 0.6], jnp.float32)
    out = jax.block_until_ready(
        attentive_statistics_pooling(x2, params, lengths=lengths2,
                                     force_chunked=True))
    _check(out, _reference(x2, params, lengths=lengths2))

    print("KERNEL_OK")
</pallas_src>

<mosaic_0001>
module attributes {stable_mosaic.version = 11 : i64} {
  func.func @_asp_fused_kernel(%arg0: i32, %arg1: memref<2xi32, #tpu.memory_space<smem>>, %arg2: memref<1x8x128xbf16, #tpu.memory_space<vmem>>, %arg3: memref<32x8xbf16, #tpu.memory_space<vmem>>, %arg4: memref<32x16xbf16, #tpu.memory_space<vmem>>, %arg5: memref<32x1xf32, #tpu.memory_space<vmem>>, %arg6: memref<32x1xf32, #tpu.memory_space<vmem>>, %arg7: memref<32x1xf32, #tpu.memory_space<vmem>>, %arg8: memref<8x32xbf16, #tpu.memory_space<vmem>>, %arg9: memref<8x1xf32, #tpu.memory_space<vmem>>, %arg10: memref<1x1x16xf32, #tpu.memory_space<vmem>>) attributes {dimension_semantics = [#tpu.dimension_semantics<parallel>], iteration_bounds = array<i64: 2>, scalar_prefetch = 1 : i64, scratch_operands = 0 : i64, tpu.core_type = #tpu.core_type<tc>, window_params = [{transform_indices = @transform_0, window_bounds = array<i64: 1, 8, 128>}, {pipeline_mode = #tpu.pipeline_mode<synchronous>, transform_indices = @transform_1, window_bounds = array<i64: 32, 8>}, {pipeline_mode = #tpu.pipeline_mode<synchronous>, transform_indices = @transform_2, window_bounds = array<i64: 32, 16>}, {pipeline_mode = #tpu.pipeline_mode<synchronous>, transform_indices = @transform_3, window_bounds = array<i64: 32, 1>}, {pipeline_mode = #tpu.pipeline_mode<synchronous>, transform_indices = @transform_4, window_bounds = array<i64: 32, 1>}, {pipeline_mode = #tpu.pipeline_mode<synchronous>, transform_indices = @transform_5, window_bounds = array<i64: 32, 1>}, {pipeline_mode = #tpu.pipeline_mode<synchronous>, transform_indices = @transform_6, window_bounds = array<i64: 8, 32>}, {pipeline_mode = #tpu.pipeline_mode<synchronous>, transform_indices = @transform_7, window_bounds = array<i64: 8, 1>}, {transform_indices = @transform_8, window_bounds = array<i64: 1, 1, 16>}]} {
    %c0 = arith.constant 0 : index
    %c0_0 = arith.constant 0 : index
    %c0_1 = arith.constant 0 : index
    %0 = vector.load %arg2[%c0, %c0_0, %c0_1] : memref<1x8x128xbf16, #tpu.memory_space<vmem>>, vector<1x8x128xbf16>
    %1 = vector.shape_cast %0 : vector<1x8x128xbf16> to vector<8x128xbf16>
    %2 = arith.index_cast %arg0 : i32 to index
    %3 = memref.load %arg1[%2] : memref<2xi32, #tpu.memory_space<smem>>
    %4 = tpu.iota {dimensions = array<i32: 1>} : vector<1x128xi32>
    %5 = vector.broadcast %3 : i32 to vector<1x128xi32>
    %6 = arith.cmpi slt, %4, %5 : vector<1x128xi32>
    %7 = tpu.iota {dimensions = array<i32: 0>} : vector<128x1xi32>
    %8 = vector.broadcast %3 : i32 to vector<128x1xi32>
    %9 = arith.cmpi slt, %7, %8 : vector<128x1xi32>
    %10 = arith.extui %9 : vector<128x1xi1> to vector<128x1xi32>
    %11 = arith.sitofp %10 : vector<128x1xi32> to vector<128x1xf32>
    %12 = arith.truncf %11 : vector<128x1xf32> to vector<128x1xbf16>
    %13 = arith.sitofp %3 : i32 to f32
    %cst = arith.constant 1.000000e+00 : f32
    %14 = arith.maximumf %13, %cst : f32
    %cst_2 = arith.constant 1.000000e+00 : f32
    %15 = arith.divf %cst_2, %14 : f32
    %cst_3 = arith.constant dense<0.000000e+00> : vector<8x1xf32>
    %16 = tpu.matmul %1, %12, %cst_3 {dimension_numbers = #tpu.dot_dimension_numbers<[1], [0], [0], [1], [0, 0, 1, 1], [], []>} : vector<8x128xbf16>, vector<128x1xbf16>, vector<8x1xf32> -> vector<8x1xf32>
    %17 = arith.mulf %1, %1 : vector<8x128xbf16>
    %cst_4 = arith.constant dense<0.000000e+00> : vector<8x1xf32>
    %18 = tpu.matmul %17, %12, %cst_4 {dimension_numbers = #tpu.dot_dimension_numbers<[1], [0], [0], [1], [0, 0, 1, 1], [], []>} : vector<8x128xbf16>, vector<128x1xbf16>, vector<8x1xf32> -> vector<8x1xf32>
    %19 = vector.broadcast %15 : f32 to vector<8x1xf32>
    %20 = arith.mulf %16, %19 : vector<8x1xf32>
    %21 = vector.broadcast %15 : f32 to vector<8x1xf32>
    %22 = arith.mulf %18, %21 : vector<8x1xf32>
    %23 = arith.mulf %20, %20 : vector<8x1xf32>
    %24 = arith.subf %22, %23 : vector<8x1xf32>
    %cst_5 = arith.constant 9.99999996E-13 : f32
    %25 = vector.broadcast %cst_5 : f32 to vector<8x1xf32>
    %26 = arith.maximumf %24, %25 : vector<8x1xf32>
    %27 = math.sqrt %26 : vector<8x1xf32>
    %28 = tpu.concatenate %20, %27 in 0 : vector<8x1xf32>, vector<8x1xf32> -> vector<16x1xf32>
    %29 = arith.truncf %28 : vector<16x1xf32> to vector<16x1xbf16>
    %c0_6 = arith.constant 0 : index
    %c0_7 = arith.constant 0 : index
    %30 = vector.load %arg4[%c0_6, %c0_7] : memref<32x16xbf16, #tpu.memory_space<vmem>>, vector<32x16xbf16>
    %cst_8 = arith.constant dense<0.000000e+00> : vector<32x1xf32>
    %31 = tpu.matmul %30, %29, %cst_8 {dimension_numbers = #tpu.dot_dimension_numbers<[1], [0], [0], [1], [0, 0, 1, 1], [], []>} : vector<32x16xbf16>, vector<16x1xbf16>, vector<32x1xf32> -> vector<32x1xf32>
    %c0_9 = arith.constant 0 : index
    %c0_10 = arith.constant 0 : index
    %32 = vector.load %arg5[%c0_9, %c0_10] : memref<32x1xf32, #tpu.memory_space<vmem>>, vector<32x1xf32>
    %33 = arith.addf %31, %32 : vector<32x1xf32>
    %c0_11 = arith.constant 0 : index
    %c0_12 = arith.constant 0 : index
    %34 = vector.load %arg3[%c0_11, %c0_12] : memref<32x8xbf16, #tpu.memory_space<vmem>>, vector<32x8xbf16>
    %cst_13 = arith.constant dense<0.000000e+00> : vector<32x128xf32>
    %35 = tpu.matmul %34, %1, %cst_13 {dimension_numbers = #tpu.dot_dimension_numbers<[1], [0], [0], [1], [0, 0, 1, 1], [], []>} : vector<32x8xbf16>, vector<8x128xbf16>, vector<32x128xf32> -> vector<32x128xf32>
    %36 = vector.broadcast %33 : vector<32x1xf32> to vector<32x128xf32>
    %37 = arith.addf %35, %36 : vector<32x128xf32>
    %cst_14 = arith.constant 0.000000e+00 : f32
    %38 = vector.broadcast %cst_14 : f32 to vector<32x128xf32>
    %39 = arith.maximumf %37, %38 : vector<32x128xf32>
    %c0_15 = arith.constant 0 : index
    %c0_16 = arith.constant 0 : index
    %40 = vector.load %arg6[%c0_15, %c0_16] : memref<32x1xf32, #tpu.memory_space<vmem>>, vector<32x1xf32>
    %41 = vector.broadcast %40 : vector<32x1xf32> to vector<32x128xf32>
    %42 = arith.mulf %39, %41 : vector<32x128xf32>
    %c0_17 = arith.constant 0 : index
    %c0_18 = arith.constant 0 : index
    %43 = vector.load %arg7[%c0_17, %c0_18] : memref<32x1xf32, #tpu.memory_space<vmem>>, vector<32x1xf32>
    %44 = vector.broadcast %43 : vector<32x1xf32> to vector<32x128xf32>
    %45 = arith.addf %42, %44 : vector<32x128xf32>
    %46 = math.tanh %45 : vector<32x128xf32>
    %c0_19 = arith.constant 0 : index
    %c0_20 = arith.constant 0 : index
    %47 = vector.load %arg8[%c0_19, %c0_20] : memref<8x32xbf16, #tpu.memory_space<vmem>>, vector<8x32xbf16>
    %48 = arith.truncf %46 : vector<32x128xf32> to vector<32x128xbf16>
    %cst_21 = arith.constant dense<0.000000e+00> : vector<8x128xf32>
    %49 = tpu.matmul %47, %48, %cst_21 {dimension_numbers = #tpu.dot_dimension_numbers<[1], [0], [0], [1], [0, 0, 1, 1], [], []>} : vector<8x32xbf16>, vector<32x128xbf16>, vector<8x128xf32> -> vector<8x128xf32>
    %c0_22 = arith.constant 0 : index
    %c0_23 = arith.constant 0 : index
    %50 = vector.load %arg9[%c0_22, %c0_23] : memref<8x1xf32, #tpu.memory_space<vmem>>, vector<8x1xf32>
    %51 = vector.broadcast %50 : vector<8x1xf32> to vector<8x128xf32>
    %52 = arith.addf %49, %51 : vector<8x128xf32>
    %cst_24 = arith.constant 0xFF800000 : f32
    %53 = vector.shape_cast %6 : vector<1x128xi1> to vector<1x128xi1>
    %54 = vector.broadcast %53 : vector<1x128xi1> to vector<8x128xi1>
    %55 = vector.broadcast %cst_24 : f32 to vector<8x128xf32>
    %56 = arith.select %54, %52, %55 : vector<8x128xi1>, vector<8x128xf32>
    %cst_25 = arith.constant dense<0xFF800000> : vector<8xf32>
    %57 = vector.multi_reduction <maximumf>, %56, %cst_25 [1] : vector<8x128xf32> to vector<8xf32>
    %58 = vector.shape_cast %57 : vector<8xf32> to vector<8x1xf32>
    %59 = vector.broadcast %58 : vector<8x1xf32> to vector<8x128xf32>
    %60 = arith.subf %56, %59 : vector<8x128xf32>
    %61 = math.exp %60 : vector<8x128xf32>
    %cst_26 = arith.constant 1.000000e+00 : f32
    %62 = vector.broadcast %cst_26 : f32 to vector<128x1xf32>
    %63 = arith.extf %1 : vector<8x128xbf16> to vector<8x128xf32>
    %64 = arith.mulf %61, %63 : vector<8x128xf32>
    %65 = arith.mulf %64, %63 : vector<8x128xf32>
    %cst_27 = arith.constant dense<0.000000e+00> : vector<8x1xf32>
    %66 = tpu.matmul %61, %62, %cst_27 {dimension_numbers = #tpu.dot_dimension_numbers<[1], [0], [0], [1], [0, 0, 1, 1], [], []>} : vector<8x128xf32>, vector<128x1xf32>, vector<8x1xf32> -> vector<8x1xf32>
    %cst_28 = arith.constant dense<0.000000e+00> : vector<8x1xf32>
    %67 = tpu.matmul %64, %62, %cst_28 {dimension_numbers = #tpu.dot_dimension_numbers<[1], [0], [0], [1], [0, 0, 1, 1], [], []>} : vector<8x128xf32>, vector<128x1xf32>, vector<8x1xf32> -> vector<8x1xf32>
    %cst_29 = arith.constant dense<0.000000e+00> : vector<8x1xf32>
    %68 = tpu.matmul %65, %62, %cst_29 {dimension_numbers = #tpu.dot_dimension_numbers<[1], [0], [0], [1], [0, 0, 1, 1], [], []>} : vector<8x128xf32>, vector<128x1xf32>, vector<8x1xf32> -> vector<8x1xf32>
    %69 = tpu.reciprocal %66 {approx = true} : vector<8x1xf32> -> vector<8x1xf32>
    %70 = arith.mulf %67, %69 : vector<8x1xf32>
    %71 = arith.mulf %68, %69 : vector<8x1xf32>
    %72 = arith.mulf %70, %70 : vector<8x1xf32>
    %73 = arith.subf %71, %72 : vector<8x1xf32>
    %cst_30 = arith.constant 9.99999996E-13 : f32
    %74 = vector.broadcast %cst_30 : f32 to vector<8x1xf32>
    %75 = arith.maximumf %73, %74 : vector<8x1xf32>
    %76 = math.sqrt %75 : vector<8x1xf32>
    %77 = tpu.concatenate %70, %76 in 0 : vector<8x1xf32>, vector<8x1xf32> -> vector<16x1xf32>
    %78 = tpu.transpose %77, [1, 0] : vector<16x1xf32> -> vector<1x16xf32>
    %c0_31 = arith.constant 0 : index
    %c0_32 = arith.constant 0 : index
    %c0_33 = arith.constant 0 : index
    %79 = vector.load %arg10[%c0_31, %c0_32, %c0_33] : memref<1x1x16xf32, #tpu.memory_space<vmem>>, vector<1x1x16xf32>
    %80 = vector.shape_cast %79 : vector<1x1x16xf32> to vector<1x16xf32>
    %81 = vector.shape_cast %78 : vector<1x16xf32> to vector<1x1x16xf32>
    tpu.vector_store %arg10[%c0_31, %c0_32, %c0_33], %81 {strides = array<i32>} : memref<1x1x16xf32, #tpu.memory_space<vmem>>, vector<1x1x16xf32>,
    return
  }
  func.func @transform_0(%arg0: i32, %arg1: memref<2xi32, #tpu.memory_space<smem>>) -> (i32, i32, i32) {
    %c0_i32 = arith.constant 0 : i32
    %c0_i32_0 = arith.constant 0 : i32
    %c0_i32_1 = arith.constant 0 : i32
    return %arg0, %c0_i32, %c0_i32_0 : i32, i32, i32
  }
  func.func @transform_1(%arg0: i32, %arg1: memref<2xi32, #tpu.memory_space<smem>>) -> (i32, i32) {
    %c0_i32 = arith.constant 0 : i32
    %c0_i32_0 = arith.constant 0 : i32
    %c0_i32_1 = arith.constant 0 : i32
    return %c0_i32, %c0_i32_0 : i32, i32
  }
  func.func @transform_2(%arg0: i32, %arg1: memref<2xi32, #tpu.memory_space<smem>>) -> (i32, i32) {
    %c0_i32 = arith.constant 0 : i32
    %c0_i32_0 = arith.constant 0 : i32
    %c0_i32_1 = arith.constant 0 : i32
    return %c0_i32, %c0_i32_0 : i32, i32
  }
  func.func @transform_3(%arg0: i32, %arg1: memref<2xi32, #tpu.memory_space<smem>>) -> (i32, i32) {
    %c0_i32 = arith.constant 0 : i32
    %c0_i32_0 = arith.constant 0 : i32
    %c0_i32_1 = arith.constant 0 : i32
    return %c0_i32, %c0_i32_0 : i32, i32
  }
  func.func @transform_4(%arg0: i32, %arg1: memref<2xi32, #tpu.memory_space<smem>>) -> (i32, i32) {
    %c0_i32 = arith.constant 0 : i32
    %c0_i32_0 = arith.constant 0 : i32
    %c0_i32_1 = arith.constant 0 : i32
    return %c0_i32, %c0_i32_0 : i32, i32
  }
  func.func @transform_5(%arg0: i32, %arg1: memref<2xi32, #tpu.memory_space<smem>>) -> (i32, i32) {
    %c0_i32 = arith.constant 0 : i32
    %c0_i32_0 = arith.constant 0 : i32
    %c0_i32_1 = arith.constant 0 : i32
    return %c0_i32, %c0_i32_0 : i32, i32
  }
  func.func @transform_6(%arg0: i32, %arg1: memref<2xi32, #tpu.memory_space<smem>>) -> (i32, i32) {
    %c0_i32 = arith.constant 0 : i32
    %c0_i32_0 = arith.constant 0 : i32
    %c0_i32_1 = arith.constant 0 : i32
    return %c0_i32, %c0_i32_0 : i32, i32
  }
  func.func @transform_7(%arg0: i32, %arg1: memref<2xi32, #tpu.memory_space<smem>>) -> (i32, i32) {
    %c0_i32 = arith.constant 0 : i32
    %c0_i32_0 = arith.constant 0 : i32
    %c0_i32_1 = arith.constant 0 : i32
    return %c0_i32, %c0_i32_0 : i32, i32
  }
  func.func @transform_8(%arg0: i32, %arg1: memref<2xi32, #tpu.memory_space<smem>>) -> (i32, i32, i32) {
    %c0_i32 = arith.constant 0 : i32
    %c0_i32_0 = arith.constant 0 : i32
    %c0_i32_1 = arith.constant 0 : i32
    return %arg0, %c0_i32, %c0_i32_0 : i32, i32, i32
  }
}

</mosaic_0001>

<bundles_post_ra>
// kernel: tpu_custom_call.1
= control target key start
LH: loop header
LB: loop body
LE: loop exit
PB: predicated region body
PF: predicated region fallthrough
CT: control target
= control target key end

     0   :  { %s1974_s0 = inlined_call_operand.vmem [shape: s32[2], index: 0, kind: input, shape index: {}]   ;;  %s1975_s1 = inlined_call_operand.vmem [shape: bf16[2,8,128], index: 1, kind: input, shape index: {}]   ;;  %s1976_s2 = inlined_call_operand.vmem [shape: bf16[32,8], index: 2, kind: input, shape index: {}]   ;;  %s1977_s3 = inlined_call_operand.vmem [shape: bf16[32,16], index: 3, kind: input, shape index: {}]   ;;  %s1978_s4 = inlined_call_operand.vmem [shape: f32[32,1], index: 4, kind: input, shape index: {}]   ;;  %s1979_s5 = inlined_call_operand.vmem [shape: f32[32,1], index: 5, kind: input, shape index: {}]   ;;  %s1980_s6 = inlined_call_operand.vmem [shape: f32[32,1], index: 6, kind: input, shape index: {}]   ;;  %s1981_s7 = inlined_call_operand.vmem [shape: bf16[8,32], index: 7, kind: input, shape index: {}]   ;;  %s1982_s8 = inlined_call_operand.vmem [shape: f32[8,1], index: 8, kind: input, shape index: {}]   ;;  %s1983_s9 = inlined_call_operand.hbm [shape: f32[2,1,16], index: 9, kind: output, shape index: {}]  }
   0x1   :  { %s14_s11 = sshll.u32 %s1974_s0, 4  ;;  %s15_s11 = int_to_ptr.vmem [resolvable:$true] %s14_s11 }
   0x2   :  { %s1537_s12 = scalar_lea.vmem %s15_s11, 16  ;;  %p1542_p1 = scmp.lt.s32.totalorder %s15_s11, %s15_s11 }
   0x3   :  { %p1538_p0 = scmp.ne.s32.totalorder %s15_s11, %s1537_s12  ;;  %p1543_p2 = scmp.lt.s32.totalorder %s1537_s12, %s1537_s12 }
   0x5   :  { %p1544_p3 = por %p1543_p2, %p1542_p1 }
   0x7   :  { %p1545_p4 = pnand %p1544_p3, %p1538_p0 }
   0x9   :  { %1548 = shalt.err (!%p1545_p4)  }
   0xa   :  { %s1615_s13 = smov [#allocation3]  }
   0xb   :  { %17 = dma.vmem_to_smem %s15_s11, 16, %s1615_s13, [#allocation2] }
   0xc   :  { %1593 = dma.done.wait [#allocation2], 16 }
   0xd   :  { %1594 = vsyncadd [#allocation2], 4294967280 }
   0xe   :  { %19 = sfence }
   0xf   :  { %20 = vsyncpa [#allocation5], 0 }
  0x10   :  { %22 = vsyncpa [#allocation5 + $0x1], 0  ;;  %s1676_s14 = smov 0   ;;  %s1678_s15 = smov 0  }
  0x11   :  { %s1680_s0 = smov 0   ;;  %s1682_s16 = smov 0  }
  0x12 LB: > { %s1697_s17 = sadd.s32 4294967295, %s1613_s16   ;;  %s1108_s18 = sadd.s32 4294967294, %s1613_s16   ;;  %s1613_s16 = sphi %s1682_s16, %s1989_s16   ;;  %s1609_s0 = sphi %s1680_s0, %s1988_s0   ;;  %s1605_s15 = sphi %s1678_s15, %s1987_s15   ;;  %s1601_s14 = sphi %s1676_s14, %s1986_s14  }
  0x13   : > { %s1701_s19 = sadd.s32 1, %s1613_s16   ;;  %s208_s20 = sadd.s32 1, %s1609_s0 }
  0x14   : > { %s205_s21 = ssub.s32 %s1613_s16, %s1701_s19  ;;  %p218_p5 = scmp.ne.s32.totalorder %s1609_s0, %s1605_s15 }
  0x15   : > { %p206_p6 = scmp.eq.s32.totalorder %s205_s21, 0  ;;  %p219_p7 = scmp.eq.s32.totalorder %s1697_s17, 1 }
  0x16   : > { %p224_p8 = scmp.ne.s32.totalorder %s1605_s15, %s1601_s14  ;;  %p225_p9 = scmp.eq.s32.totalorder %s1108_s18, 1 }
  0x17   : > { %s1712_s22 = scalar_select %p206_p6, %s1609_s0, %s208_s20  }
  0x18   : > { %p1714_p10 = por %p219_p7, %p218_p5  ;;  %p1718_p11 = por %p225_p9, %p224_p8 }
  0x19   : > { %p1111_p12 = scmp.ge.s32.totalorder %s1613_s16, 1  ;;  %p271_p13 = scmp.lt.s32.totalorder %s1613_s16, 3 }
  0x1b   : > { %p272_p0 = pnand %p1111_p12, %p271_p13 }
  0x1c   : > { %s309_s25 = sld [smem:[#allocation3 + %s1697_s17]] (!%p272_p0)  ;;  %v310_v0 = vlaneseq (!%p272_p0)  ;;  %v1616_v1 = vmov (!%p272_p0), 0.0   ;;  %vm1617_vm0 = vmmov (!%p272_p0), 0   ;;  %s1618_s27 = smov (!%p272_p0), 1.0   ;;  %v1619_v9 = vmov (!%p272_p0), 1.0|1.0  }
  0x1d   : > { %275 = sbr.rel (%p272_p0) target bundleno = 1462 (0x5b6), region = 52  ;;  %1251 = vmatprep.subr.bf16.mxu0 (!%p272_p0), %v1616_v1  ;;  %1271 = vmatprep.subr.bf16.mxu1 (!%p272_p0), %v1616_v1  ;;  %p303_p1 = scmp.lt.s32.totalorder (!%p272_p0), %s1697_s17, 1  ;;  %v1515_v24 = vld [vmem:[%s1977_s3] sm:$0xff] (!%p272_p0)   ;;  %v660_v25 = vld [vmem:[%s1979_s5 + $0x8] sm:$0xff] (!%p272_p0)  ;;  %v1620_v27 = vmov (!%p272_p0), 0   ;;  %v493_v52 = vld [vmem:[%s1978_s4 + $0x10] sm:$0xff] (!%p272_p0) }
  0x1e   : > { %v1728_v2 = vshrl.u32 (!%p272_p0), %v310_v0, 7  ;;  %1267 = vmatprep.mubr.msk.bf16.mxu0 (!%p272_p0), %vm1617_vm0, %v1616_v1  ;;  %1287 = vmatprep.mubr.msk.bf16.mxu1 (!%p272_p0), %vm1617_vm0, %v1616_v1  ;;  %v659_v26 = vld [vmem:[%s1979_s5] sm:$0xff] (!%p272_p0)  ;;  %v1516_v48 = vld [vmem:[%s1977_s3 + $0x8] sm:$0xff] (!%p272_p0)   ;;  %v494_v58 = vld [vmem:[%s1978_s4 + $0x18] sm:$0xff] (!%p272_p0)  ;;  %s301_s11 = sand.u32 (!%p272_p0), 1, %s1605_s15  }
  0x1f   : > { %1514 = vset.pattern.permute.xlu1 (!%p272_p0), %v1620_v27  ;;  %1513 = vset.pattern.permute.xlu0 (!%p272_p0), %v1620_v27  ;;  %v1517_v49 = vld [vmem:[%s1976_s2] sm:$0xff] (!%p272_p0)   ;;  %v1518_v51 = vld [vmem:[%s1976_s2 + $0x8] sm:$0xff] (!%p272_p0)   ;;  %s302_s13 = scalar_lea.vmem (!%p272_p0), [#allocation4], %s301_s11 }
  0x20   : > { %v316_v3 = vadd.s32 (!%p272_p0), 8, %v1728_v2  ;;  %v317_v4 = vadd.s32 (!%p272_p0), 16, %v1728_v2  ;;  %v318_v5 = vadd.s32 (!%p272_p0), 24, %v1728_v2  ;;  %v319_v7 = vadd.s32 (!%p272_p0), 32, %v1728_v2  ;;  %670 = vperm.xlu1 (!%p272_p0), %1514, %v660_v25   ;;  %665 = vperm.xlu0 (!%p272_p0), %1513, %v659_v26   ;;  %v491_v53 = vld [vmem:[%s1978_s4] sm:$0xff] (!%p272_p0)  ;;  %v492_v61 = vld [vmem:[%s1978_s4 + $0x8] sm:$0xff] (!%p272_p0) }
  0x21   : > { %v320_v8 = vadd.s32 (!%p272_p0), 40, %v1728_v2  ;;  %v321_v10 = vadd.s32 (!%p272_p0), 48, %v1728_v2  ;;  %v322_v11 = vadd.s32 (!%p272_p0), 56, %v1728_v2  ;;  %v323_v13 = vadd.s32 (!%p272_p0), 64, %v1728_v2  ;;  %s1053_s18 = sshll.u32 (!%p272_p0), %s302_s13, 4  ;;  %s1934_s18 = int_to_ptr.vmem [resolvable:$true] %s1053_s18 }
  0x22   : > { %v1737_v6 = vstv (!%p272_p0), %s309_s25  ;;  %s387_s26 = scvt.s32.f32 (!%p272_p0), %s309_s25  ;;  %v324_v14 = vadd.s32 (!%p272_p0), 72, %v1728_v2  ;;  %v325_v15 = vadd.s32 (!%p272_p0), 80, %v1728_v2  ;;  %v326_v16 = vadd.s32 (!%p272_p0), 88, %v1728_v2 }
  0x23   : > { %vm331_vm1 = vcmp.lt.s32.totalorder (!%p272_p0), %v1728_v2, %v1737_v6  ;;  %vm332_vm2 = vcmp.lt.s32.totalorder (!%p272_p0), %v316_v3, %v1737_v6  ;;  %vm333_vm3 = vcmp.lt.s32.totalorder (!%p272_p0), %v317_v4, %v1737_v6  ;;  %vm334_vm4 = vcmp.lt.s32.totalorder (!%p272_p0), %v318_v5, %v1737_v6  ;;  %v687_v4 = vld [vmem:[%s1980_s6] sm:$0xff] (!%p272_p0) }
  0x24   : > { %vm1129_vm5 = vmpackc.low %vm332_vm2, %vm331_vm1  ;;  %s388_s28 = smax.f32 %s1618_s27, %s387_s26  ;;  %vm335_vm7 = vcmp.lt.s32.totalorder %v319_v7, %v1737_v6  ;;  %vm336_vm8 = vcmp.lt.s32.totalorder %v320_v8, %v1737_v6  ;;  %vm337_vm10 = vcmp.lt.s32.totalorder %v321_v10, %v1737_v6  ;;  %vm338_vm11 = vcmp.lt.s32.totalorder %v322_v11, %v1737_v6  ;;  %v662_v10 = vld [vmem:[%s1979_s5 + $0x18] sm:$0xff]  ;;  %v661_v11 = vld [vmem:[%s1979_s5 + $0x10] sm:$0xff]  ;;  %s1041_s26 = scalar_lea.sflag [#allocation5], %s301_s11 }
  0x25   : > { %1252 = vmatpush3.bf16.msk.msra.mxu0 %vm1129_vm5, %v1619_v9  ;;  %1272 = vmatpush3.bf16.msk.msra.mxu1 %vm1129_vm5, %v1619_v9  ;;  %vm1131_vm6 = vmpackc.low %vm334_vm4, %vm333_vm3  ;;  %v389_v12 = vstv %s388_s28  ;;  %vm339_vm13 = vcmp.lt.s32.totalorder %v323_v13, %v1737_v6  ;;  %vm340_vm14 = vcmp.lt.s32.totalorder %v324_v14, %v1737_v6  ;;  %vm341_vm1 = vcmp.lt.s32.totalorder %v325_v15, %v1737_v6  ;;  %s304_s29 = scalar_select %p303_p1, %s1697_s17, 1  ;;  %v689_v13 = vld [vmem:[%s1980_s6 + $0x10] sm:$0xff]  ;;  %v722_v14 = vld [vmem:[%s1982_s8] sm:$0xff] }
  0x26   : > { %1253 = vmatprep.subr.bf16.mxu0 %v1616_v1  ;;  %1273 = vmatprep.subr.bf16.mxu1 %v1616_v1  ;;  %1519 = vrcp.f32 %v389_v12  ;;  %vm1133_vm9 = vmpackc.low %vm336_vm8, %vm335_vm7  ;;  %vm342_vm2 = vcmp.lt.s32.totalorder %v326_v16, %v1737_v6  ;;  %v327_v18 = vadd.s32 96, %v1728_v2  ;;  %v328_v19 = vadd.s32 104, %v1728_v2  ;;  %v690_v12 = vld [vmem:[%s1980_s6 + $0x18] sm:$0xff] }
  0x27   : > { %vm1135_vm12 = vmpackc.low %vm338_vm11, %vm337_vm10  ;;  %v329_v20 = vadd.s32 112, %v1728_v2  ;;  %v330_v21 = vadd.s32 120, %v1728_v2  ;;  %s1112_s30 = sshll.u32 %s304_s29, 2  ;;  %vm505_vm10 = vcmask 130048   ;;  %v688_v2 = vld [vmem:[%s1980_s6 + $0x8] sm:$0xff] }
  0x28   : > { %vm1137_vm15 = vmpackc.low %vm340_vm14, %vm339_vm13  ;;  %vm343_vm4 = vcmp.lt.s32.totalorder %v327_v18, %v1737_v6  ;;  %vm344_vm5 = vcmp.lt.s32.totalorder %v328_v19, %v1737_v6  ;;  %s306_s12 = scalar_lea.vmem %s1975_s1, %s1112_s30  ;;  %vm602_vm13 = vcmask 1043456   ;;  %vm595_vm14 = vcmask 64512  }
  0x29   : > { %1254 = vmatpush3.bf16.msk.msra.mxu0 %vm1131_vm6, %v1619_v9  ;;  %1274 = vmatpush3.bf16.msk.msra.mxu1 %vm1131_vm6, %v1619_v9  ;;  %vm1139_vm3 = vmpackc.low %vm342_vm2, %vm341_vm1  ;;  %vm345_vm7 = vcmp.lt.s32.totalorder %v329_v20, %v1737_v6  ;;  %vm346_vm8 = vcmp.lt.s32.totalorder %v330_v21, %v1737_v6  ;;  %v1799_v22 = vld [vmem:[%s306_s12] sm:$0xf]  ;;  %s1170_s12 = sshll.u32 %s1697_s17, 4  ;;  %s1622_s17 = smov [#allocation4]  }
  0x2a   : > { %1255 = vmatprep.subr.bf16.mxu0 %v1616_v1  ;;  %1275 = vmatprep.subr.bf16.mxu1 %v1616_v1  ;;  %vm1141_vm6 = vmpackc.low %vm344_vm5, %vm343_vm4  ;;  %v432_v23 = vmul.bf16 %v1799_v22, %v1799_v22  ;;  %v604_v50 = vsel %vm602_vm13, %v1799_v22, 0  ;;  %s1932_s25 = scalar_lea.hbm %s1983_s9, %s1170_s12  ;;  %s1553_s28 = sshll.u32 %s1622_s17, 4  ;;  %s1554_s28 = int_to_ptr.vmem [resolvable:$false] %s1553_s28 }
  0x2b   : > { %s1555_s29 = scalar_lea.vmem %s1554_s28, 32  ;;  %p1556_p5 = scmp.lt.s32.totalorder %s1934_s18, %s1554_s28 }
  0x2d   : > { %1256 = vmatpush3.bf16.msk.msra.mxu0 %vm1133_vm9, %v1619_v9  ;;  %1276 = vmatpush3.bf16.msk.msra.mxu1 %vm1133_vm9, %v1619_v9  ;;  %vm1143_vm9 = vmpackc.low %vm346_vm8, %vm345_vm7 }
  0x2e   : > { %1257 = vmatprep.subr.bf16.mxu0 %v1616_v1  ;;  %1277 = vmatprep.subr.bf16.mxu1 %v1616_v1 }
  0x30   : > { %v1520_v17 = vpop.eup %1519 }
  0x31   : > { %1258 = vmatpush3.bf16.msk.msra.mxu0 %vm1135_vm12, %v1619_v9  ;;  %1278 = vmatpush3.bf16.msk.msra.mxu1 %vm1135_vm12, %v1619_v9  ;;  %1465 = vpush %v1520_v17 }
  0x32   : > { %1259 = vmatprep.subr.bf16.mxu0 %v1616_v1  ;;  %1279 = vmatprep.subr.bf16.mxu1 %v1616_v1 }
  0x35   : > { %1260 = vmatpush3.bf16.msk.msra.mxu0 %vm1137_vm15, %v1619_v9  ;;  %1280 = vmatpush3.bf16.msk.msra.mxu1 %vm1137_vm15, %v1619_v9  ;;  %vm728_vm15 = vcmask 261120  }
  0x36   : > { %1261 = vmatprep.subr.bf16.mxu0 %v1616_v1  ;;  %1281 = vmatprep.subr.bf16.mxu1 %v1616_v1 }
  0x39   : > { %1262 = vmatpush3.bf16.msk.msra.mxu0 %vm1139_vm3, %v1619_v9  ;;  %1282 = vmatpush3.bf16.msk.msra.mxu1 %vm1139_vm3, %v1619_v9  ;;  %vm1038_vm3 = vcmask 122880  }
  0x3a   : > { %1263 = vmatprep.subr.bf16.mxu0 %v1616_v1  ;;  %1283 = vmatprep.subr.bf16.mxu1 %v1616_v1 }
  0x3d   : > { %1264 = vmatpush3.bf16.msk.msra.mxu0 %vm1141_vm6, %v1619_v9  ;;  %1284 = vmatpush3.bf16.msk.msra.mxu1 %vm1141_vm6, %v1619_v9 }
  0x3e   : > { %1265 = vmatprep.subr.bf16.mxu0 %v1616_v1  ;;  %1285 = vmatprep.subr.bf16.mxu1 %v1616_v1 }
  0x41   : > { %1266 = vmatpush3.bf16.msk.msra.mxu0 %vm1143_vm9, %v1619_v9  ;;  %1286 = vmatpush3.bf16.msk.msra.mxu1 %vm1143_vm9, %v1619_v9 }
  0x44   : > { %1268 = vmatmul.mubr.bf16.vlgmr.msra.gmra.mrb[0].mxu0 %v1799_v22  ;;  %1288 = vmatmul.mubr.bf16.vlgmr.msra.gmra.mrb[0].mxu1 %v432_v23 }
  0x45   : > { %1343 = vmatprep.mubr.msk.f32.mxu1 %vm1617_vm0, %v1616_v1  ;;  %1293 = vmatprep.mubr.msk.bf16.mxu0 %vm505_vm10, %v1515_v24 }
  0x62   : > { %s1466_s27 = spop %1465 }
  0x63   : > { %v473_v28 = vstv %s1466_s27  ;;  %s1549_s27 = scalar_lea.vmem %s1934_s18, 16 }
  0x64   : > { %p1550_p2 = scmp.ne.s32.totalorder %s1934_s18, %s1549_s27  ;;  %p1557_p6 = scmp.lt.s32.totalorder %s1555_s29, %s1549_s27 }
  0x66   : > { %p1551_p3 = pnand %p1550_p2, %p1714_p10  ;;  %p1558_p7 = por %p1557_p6, %p1556_p5 }
  0x68   : > { %p1552_p4 = pneg %p1551_p3 }
  0x6a   : > { %p1559_p8 = pnand %p1558_p7, %p1552_p4 }
  0x9f   : > { %v671_v15 = vpop.permute.xlu1 %670  ;;  %v666_v16 = vpop.permute.xlu0 %665 }
 0x117   : > { %v426_v29 = vpop.f32.mrb[0].mxu0  ;;  %v467_v30 = vpop.f32.mrb[0].mxu1 }
 0x118   : > { %v474_v31 = vmul.f32 %v473_v28, %v426_v29  ;;  %v1269_v32 = vpop.f32.mrb[1].mxu0  ;;  %v1289_v33 = vpop.f32.mrb[1].mxu1  ;;  %v475_v37 = vmul.f32 %v473_v28, %v467_v30 }
 0x119   : > { %v429_v34 = vpop.f32.mrb[2].mxu0  ;;  %v470_v35 = vpop.f32.mrb[2].mxu1 }
 0x11a   : > { %v476_v36 = vmul.f32 %v474_v31, %v474_v31  ;;  %v1270_v38 = vpop.f32.mrb[3].mxu0  ;;  %v1290_v39 = vpop.f32.mrb[3].mxu1 }
 0x11c   : > { %v477_v40 = vsub.f32 %v475_v37, %v476_v36 }
 0x11e   : > { %v478_v41 = vmax.f32 %v477_v40, 1e-12 }
 0x120   : > { %1521 = vrsqrt.f32 %v478_v41  ;;  %vm481_vm11 = vcmp.eq.f32.partialorder %v478_v41, inf  ;;  %v484_v44 = vand.u32 2147483648, %v478_v41  ;;  %vm483_vm12 = vcmp.eq.f32.partialorder %v478_v41, 0.0 }
 0x12a   : > { %v1522_v42 = vpop.eup %1521 }
 0x12b   : > { %v480_v43 = vmul.f32 %v1522_v42, %v478_v41 }
 0x12d   : > { %v482_v45 = vsel %vm481_vm11, %v478_v41, %v480_v43 }
 0x12e   : > { %v485_v46 = vsel %vm483_vm12, %v484_v44, %v482_v45 }
 0x12f   : > { %v486_v47 = vpack.c.bf16 %v485_v46, %v474_v31 }
 0x131   : > { %1291 = vmatprep.subr.bf16.mxu0 %v486_v47 }
 0x132   : > { %1292 = vmatpush3.bf16.msra.mxu0 %v486_v47 }
 0x133   : > { %1464 = vmatprep.subr.msk.bf16.mxu0 %vm602_vm13, %v1799_v22 }
 0x135   : > { %1294 = vmatmul.mubr.msk.bf16.vlgmr.msra.gmra.mrb[4].mxu0 %vm505_vm10, %v1516_v48 }
 0x136   : > { %1298 = vmatpush3.bf16.msra.mxu0 %v604_v50  ;;  %1299 = vmatprep.mubr.msk.bf16.mxu0 %vm595_vm14, %v1517_v49  ;;  %v719_v50 = vld [vmem:[%s1981_s7] sm:$0xf] }
 0x137   : > { %1303 = vmatprep.subr.bf16.mxu0 %v1616_v1 }
 0x13d   : > { %1300 = vmatmul.mubr.msk.bf16.vlgmr.msra.gmra.mrb[8].mxu0 %vm595_vm14, %v1518_v51  ;;  %v1621_v51 = vmov 0.0|0.0  }
 0x13e   : > { %1307 = vmatprep.mubr.msk.bf16.mxu0 %vm1617_vm0, %v1616_v1  ;;  %1416 = vmatprep.subr.bf16.mxu1 %v1621_v51 }
 0x13f   : > { %1417 = vmatpush3.bf16.msra.mxu1 %v1619_v9 }
 0x140   : > { %1418 = vmatprep.subr.bf16.mxu1 %v1621_v51 }
 0x143   : > { %1419 = vmatpush3.bf16.msra.mxu1 %v1619_v9 }
 0x144   : > { %1420 = vmatprep.subr.bf16.mxu1 %v1621_v51 }
 0x147   : > { %1421 = vmatpush3.bf16.msra.mxu1 %v1619_v9 }
 0x148   : > { %1422 = vmatprep.subr.bf16.mxu1 %v1621_v51 }
 0x14b   : > { %1423 = vmatpush3.bf16.msra.mxu1 %v1619_v9 }
 0x14c   : > { %1424 = vmatprep.subr.bf16.mxu1 %v1621_v51 }
 0x14f   : > { %1425 = vmatpush3.bf16.msra.mxu1 %v1619_v9 }
 0x150   : > { %1426 = vmatprep.subr.bf16.mxu1 %v1621_v51 }
 0x153   : > { %1427 = vmatpush3.bf16.msra.mxu1 %v1619_v9 }
 0x154   : > { %1428 = vmatprep.subr.bf16.mxu1 %v1621_v51 }
 0x157   : > { %1429 = vmatpush3.bf16.msra.mxu1 %v1619_v9 }
 0x158   : > { %1430 = vmatprep.subr.bf16.mxu1 %v1621_v51 }
 0x15b   : > { %1431 = vmatpush3.bf16.msra.mxu1 %v1619_v9 }
 0x15c   : > { %1448 = vmatprep.subr.bf16.mxu1 %v1621_v51 }
 0x208   : > { %v1295_v54 = vpop.f32.mrb[4].mxu0 }
 0x209   : > { %v555_v55 = vadd.f32 %v1295_v54, %v493_v52  ;;  %v546_v56 = vpop.f32.mrb[5].mxu0  ;;  %v311_v52 = vand.u32 127, %v310_v0 }
 0x20a   : > { %v547_v57 = vadd.f32 %v546_v56, %v491_v53  ;;  %v1296_v59 = vpop.f32.mrb[6].mxu0 }
 0x20b   : > { %577 = vperm.xlu1 %1514, %v555_v55   ;;  %v549_v60 = vpop.f32.mrb[7].mxu0  ;;  %v558_v62 = vadd.f32 %v1296_v59, %v494_v58  ;;  %vm313_vm1 = vcmp.lt.s32.totalorder %v311_v52, %v1737_v6 }
 0x20c   : > { %567 = vperm.xlu0 %1513, %v547_v57   ;;  %v550_v63 = vadd.f32 %v549_v60, %v492_v61 }
 0x20f   : > { %582 = vperm.xlu1 %1514, %v558_v62  }
 0x210   : > { %572 = vperm.xlu0 %1513, %v550_v63   ;;  %v1301_v3 = vpop.f32.mrb[8].mxu0  ;;  %v780_v63 = vunpack.c.l.bf16 %v1799_v22 }
 0x211   : > { %v640_v5 = vpop.f32.mrb[9].mxu0 }
 0x212   : > { %v1302_v7 = vpop.f32.mrb[10].mxu0 }
 0x213   : > { %698 = vperm.xlu1 %1514, %v688_v2   ;;  %v643_v8 = vpop.f32.mrb[11].mxu0 }
 0x214   : > { %693 = vperm.xlu0 %1513, %v687_v4  }
 0x217   : > { %680 = vperm.xlu1 %1514, %v662_v10  }
 0x218   : > { %675 = vperm.xlu0 %1513, %v661_v11  }
 0x21b   : > { %708 = vperm.xlu1 %1514, %v690_v12  }
 0x21c   : > { %703 = vperm.xlu0 %1513, %v689_v13  }
 0x220   : > { %725 = vperm.xlu0 %1513, %v722_v14  }
 0x28a   : > { %v578_v17 = vpop.permute.xlu1 %577 }
 0x28b   : > { %v568_v18 = vpop.permute.xlu0 %567  ;;  %v649_v30 = vadd.f32 %v1301_v3, %v578_v17 }
 0x28c   : > { %v641_v19 = vadd.f32 %v640_v5, %v568_v18 }
 0x28d   : > { %v657_v37 = vmax.f32 %v649_v30, 0.0 }
 0x28e   : > { %v655_v20 = vmax.f32 %v641_v19, 0.0  ;;  %v583_v21 = vpop.permute.xlu1 %582 }
 0x28f   : > { %v573_v23 = vpop.permute.xlu0 %572  ;;  %v652_v28 = vadd.f32 %v1302_v7, %v583_v21 }
 0x290   : > { %v644_v24 = vadd.f32 %v643_v8, %v573_v23  ;;  %v683_v27 = vmul.f32 %v666_v16, %v655_v20 }
 0x291   : > { %v658_v35 = vmax.f32 %v652_v28, 0.0 }
 0x292   : > { %v656_v25 = vmax.f32 %v644_v24, 0.0  ;;  %v699_v26 = vpop.permute.xlu1 %698 }
 0x293   : > { %v694_v29 = vpop.permute.xlu0 %693 }
 0x294   : > { %v684_v31 = vmul.f32 %v671_v15, %v656_v25  ;;  %v711_v32 = vadd.f32 %v694_v29, %v683_v27 }
 0x296   : > { %v712_v33 = vadd.f32 %v699_v26, %v684_v31  ;;  %v681_v34 = vpop.permute.xlu1 %680  ;;  %1523 = vtanh.f32 %v711_v32 }
 0x297   : > { %v676_v36 = vpop.permute.xlu0 %675  ;;  %v686_v38 = vmul.f32 %v681_v34, %v658_v35 }
 0x298   : > { %1525 = vtanh.f32 %v712_v33  ;;  %v685_v39 = vmul.f32 %v676_v36, %v657_v37 }
 0x29a   : > { %v709_v40 = vpop.permute.xlu1 %708 }
 0x29b   : > { %v714_v41 = vadd.f32 %v709_v40, %v686_v38  ;;  %v704_v42 = vpop.permute.xlu0 %703 }
 0x29c   : > { %v713_v43 = vadd.f32 %v704_v42, %v685_v39 }
 0x29d   : > { %1527 = vtanh.f32 %v714_v41 }
 0x29e   : > { %1529 = vtanh.f32 %v713_v43 }
 0x29f   : > { %v726_v53 = vpop.permute.xlu0 %725 }
 0x2a0   : > { %v1524_v44 = vpop.eup %1523 }
 0x2a2   : > { %v1526_v45 = vpop.eup %1525 }
 0x2a3   : > { %v720_v46 = vpack.c.bf16 %v1526_v45, %v1524_v44 }
 0x2a5   : > { %1304 = vmatpush3.bf16.msra.mxu0 %v720_v46 }
 0x2a6   : > { %1305 = vmatprep.subr.bf16.mxu0 %v1616_v1 }
 0x2a7   : > { %v1528_v47 = vpop.eup %1527 }
 0x2a8   : > { %v1530_v48 = vpop.eup %1529 }
 0x2a9   : > { %v721_v49 = vpack.c.bf16 %v1528_v47, %v1530_v48 }
 0x2ab   : > { %1306 = vmatpush3.bf16.msra.mxu0 %v721_v49 }
 0x2ac   : > { %1432 = vmatprep.subr.bf16.mxu0 %v1621_v51 }
 0x2ae   : > { %1308 = vmatmul.mubr.msk.bf16.vlgmr.msra.gmra.mrb[12].mxu0 %vm728_vm15, %v719_v50 }
 0x2af   : > { %1378 = vmatprep.mubr.msk.f32.mxu0 %vm1617_vm0, %v1616_v1  ;;  %1433 = vmatpush3.bf16.msra.mxu0 %v1619_v9 }
 0x2b0   : > { %1434 = vmatprep.subr.bf16.mxu0 %v1621_v51 }
 0x2b3   : > { %1435 = vmatpush3.bf16.msra.mxu0 %v1619_v9 }
 0x2b4   : > { %1436 = vmatprep.subr.bf16.mxu0 %v1621_v51 }
 0x2b7   : > { %1437 = vmatpush3.bf16.msra.mxu0 %v1619_v9 }
 0x2b8   : > { %1438 = vmatprep.subr.bf16.mxu0 %v1621_v51 }
 0x2bb   : > { %1439 = vmatpush3.bf16.msra.mxu0 %v1619_v9 }
 0x2bc   : > { %1440 = vmatprep.subr.bf16.mxu0 %v1621_v51 }
 0x2bf   : > { %1441 = vmatpush3.bf16.msra.mxu0 %v1619_v9 }
 0x2c0   : > { %1442 = vmatprep.subr.bf16.mxu0 %v1621_v51 }
 0x2c3   : > { %1443 = vmatpush3.bf16.msra.mxu0 %v1619_v9 }
 0x2c4   : > { %1444 = vmatprep.subr.bf16.mxu0 %v1621_v51 }
 0x2c7   : > { %1445 = vmatpush3.bf16.msra.mxu0 %v1619_v9 }
 0x2c8   : > { %1446 = vmatprep.subr.bf16.mxu0 %v1621_v51 }
 0x2cb   : > { %1447 = vmatpush3.bf16.msra.mxu0 %v1619_v9 }
 0x381   : > { %v766_v54 = vpop.f32.mrb[12].mxu0 }
 0x382   : > { %v767_v55 = vadd.f32 %v766_v54, %v726_v53  ;;  %v1309_v56 = vpop.f32.mrb[13].mxu0 }
 0x383   : > { %v769_v57 = vpop.f32.mrb[14].mxu0 }
 0x384   : > { %v774_v58 = vsel %vm313_vm1, %v767_v55, -inf  ;;  %v1310_v59 = vpop.f32.mrb[15].mxu0 }
 0x385   : > { %775 = vmax.xlane.f32.xlu1 %v774_v58 }
 0x412   : > { %v776_v60 = vpop.xlane.xlu1 %775 }
 0x413   : > { %v777_v61 = vsub.f32 %v774_v58, %v776_v60 }
 0x415   : > { %v778_v62 = vmul.f32 1.442695, %v777_v61 }
 0x417   : > { %1531 = vpow2.f32 %v778_v62 }
 0x421   : > { %v1532_v2 = vpop.eup %1531 }
 0x422   : > { %1344 = vmatmul.mubr.f32.vlgmr.msra.gmra.mrb[4].mxu1 %v1532_v2  ;;  %v781_v3 = vmul.f32 %v1532_v2, %v780_v63 }
 0x423   : > { %1449 = vmatpush3.bf16.msra.mxu1 %v1619_v9  ;;  %1413 = vmatprep.mubr.msk.f32.mxu1 %vm1617_vm0, %v1616_v1 }
 0x424   : > { %1379 = vmatmul.mubr.f32.vlgmr.msra.gmra.mrb[16].mxu0 %v781_v3  ;;  %1450 = vmatprep.subr.bf16.mxu1 %v1621_v51  ;;  %v782_v0 = vmul.f32 %v781_v3, %v780_v63 }
 0x427   : > { %1451 = vmatpush3.bf16.msra.mxu1 %v1619_v9 }
 0x428   : > { %1452 = vmatprep.subr.bf16.mxu1 %v1621_v51 }
 0x42b   : > { %1453 = vmatpush3.bf16.msra.mxu1 %v1619_v9 }
 0x42c   : > { %1454 = vmatprep.subr.bf16.mxu1 %v1621_v51 }
 0x42f   : > { %1455 = vmatpush3.bf16.msra.mxu1 %v1619_v9 }
 0x430   : > { %1456 = vmatprep.subr.bf16.mxu1 %v1621_v51 }
 0x433   : > { %1457 = vmatpush3.bf16.msra.mxu1 %v1619_v9 }
 0x434   : > { %1458 = vmatprep.subr.bf16.mxu1 %v1621_v51 }
 0x437   : > { %1459 = vmatpush3.bf16.msra.mxu1 %v1619_v9 }
 0x438   : > { %1460 = vmatprep.subr.bf16.mxu1 %v1621_v51 }
 0x43b   : > { %1461 = vmatpush3.bf16.msra.mxu1 %v1619_v9 }
 0x43c   : > { %1462 = vmatprep.subr.bf16.mxu1 %v1621_v51 }
 0x43f   : > { %1463 = vmatpush3.bf16.msra.mxu1 %v1619_v9 }
 0x442   : > { %1414 = vmatmul.mubr.f32.vlgmr.msra.gmra.mrb[6].mxu1 %v782_v0 }
 0x4f5   : > { %v849_v1 = vpop.f32.mrb[4].mxu1 }
 0x4f6   : > { %1533 = vrcp.f32 %v849_v1  ;;  %v1345_v6 = vpop.f32.mrb[5].mxu1 }
 0x4f7   : > { %v919_v22 = vpop.f32.mrb[16].mxu0 }
 0x4f8   : > { %v1380_v4 = vpop.f32.mrb[17].mxu0 }
 0x500   : > { %v1534_v5 = vpop.eup %1533 }
 0x501   : > { %v994_v7 = vmul.f32 %v1534_v5, %v919_v22 }
 0x503   : > { %1006 = vxpose.xlu0.b32.start [1/2] (short) (narrow) %v994_v7, 8  ;;  %v996_v10 = vmul.f32 %v994_v7, %v994_v7 }
 0x515   : > { %v989_v8 = vpop.f32.mrb[6].mxu1 }
 0x516   : > { %v995_v11 = vmul.f32 %v1534_v5, %v989_v8  ;;  %v1415_v12 = vpop.f32.mrb[7].mxu1 }
 0x518   : > { %v997_v13 = vsub.f32 %v995_v11, %v996_v10 }
 0x51a   : > { %v998_v14 = vmax.f32 %v997_v13, 1e-12 }
 0x51c   : > { %1535 = vrsqrt.f32 %v998_v14  ;;  %vm1001_vm0 = vcmp.eq.f32.partialorder %v998_v14, inf  ;;  %v1004_v16 = vand.u32 2147483648, %v998_v14  ;;  %vm1003_vm2 = vcmp.eq.f32.partialorder %v998_v14, 0.0 }
 0x526   : > { %v1536_v9 = vpop.eup %1535 }
 0x527   : > { %v1000_v15 = vmul.f32 %v1536_v9, %v998_v14 }
 0x529   : > { %v1002_v17 = vsel %vm1001_vm0, %v998_v14, %v1000_v15 }
 0x52a   : > { %v1005_v18 = vsel %vm1003_vm2, %v1004_v16, %v1002_v17 }
 0x52b   : > { %1007 = vxpose.xlu0.b32.end [2/2] (short) (narrow) %v1005_v18, 8 }
 0x5a7   : > { %v1022_v19 = vpop.trf.xlu0 }
 0x5a8   : > { %1039 = vst.msk [vmem:[%s302_s13] sm:$0x1] %vm1038_vm3, %v1022_v19 }
 0x5a9   : > { %1562 = shalt.err (!%p1559_p8)
}
 0x5aa   : > { %s1563_s30 = scalar_lea.hbm %s1932_s25, 16  ;;  %s1567_s12 = scalar_lea.hbm %s1983_s9, 32 }
 0x5ab   : > { %p1564_p9 = scmp.ne.s32.totalorder %s1932_s25, %s1563_s30  ;;  %p1568_p0 = scmp.lt.u32.totalorder %s1932_s25, %s1983_s9 }
 0x5ac   : > { %p1569_p1 = scmp.lt.u32.totalorder %s1567_s12, %s1563_s30  ;;  %p1571_p3 = scmp.lt.u32.totalorder %s1563_s30, %s1932_s25 }
 0x5ad   : > { %p1565_p12 = pnand %p1564_p9, %p1714_p10 }
 0x5ae   : > { %p1570_p2 = por %p1569_p1, %p1568_p0 }
 0x5af   : > { %p1566_p13 = pneg %p1565_p12 }
 0x5b0   : > { %p1572_p4 = por %p1571_p3, %p1570_p2 }
 0x5b2   : > { %p1573_p5 = pnand %p1572_p4, %p1566_p13 }
 0x5b4   : > { %1576 = shalt.err (!%p1573_p5)
}
 0x5b5   : > { %1467 = dma.vmem_to_hbm [thread:$0]  (%p1714_p10), %s1934_s18, 16, %s1932_s25, %s1041_s26  }
 0x5b6 PF: > { %p1473_p6 = scmp.ge.s32.totalorder %s1613_s16, 2  ;;  %s1065_s21 = sand.u32 1, %s1601_s14  }
 0x5b7   : > { %s1066_s27 = scalar_lea.sflag [#allocation5], %s1065_s21 }
 0x5b8   : > { %p1470_p7 = pnand %p1473_p6, %p1718_p11 }
 0x5ba   : > { %1596 = dma.done.wait (!%p1470_p7), %s1066_s27, 16  }
 0x5bb   : > { %1598 = vsyncadd (!%p1470_p7), %s1066_s27, 4294967280  ;;  %p25_p8 = scmp.ge.s32.totalorder %s1701_s19, 4   ;;  %s1986_s14 = smov %s1605_s15 }
 0x5bc   : > { %s1987_s15 = smov %s1609_s0  ;;  %s1988_s0 = smov %s1712_s22 }
 0x5bd   : > { %s1989_s16 = smov %s1701_s19  ;;  %27 = sbr.rel (!%p25_p8) target bundleno = 18 (0x12), region = 87 }
 0x5c4   :  { %1070 = vsyncpa [#allocation5], 1 }
 0x5c5   :  { %1072 = vsyncpa [#allocation5 + $0x1], 1 }

</bundles_post_ra>
